<compile_context>
chip_gen: v6e
topology: v6e:2x2x1
jax: 0.10.0
libtpu: 0.0.40
codegen_flags: <defaults>
</compile_context>

<pallas_src>
import functools

import jax
import jax.numpy as jnp
from jax.experimental import pallas as pl
from jax.experimental.pallas import tpu as pltpu


# ----------------------------- in-kernel helpers -----------------------------

_SQRT_HALF = 0.7071067811865476


def _erf_approx(x):
    # Abramowitz & Stegun 7.1.26, max abs error ~1.5e-7: keeps torch's exact
    # erf-GELU semantics to ~1e-7 while only needing VPU ops + one EUP exp.
    a1, a2, a3, a4, a5 = (0.254829592, -0.284496736, 1.421413741,
                          -1.453152027, 1.061405429)
    p = 0.3275911
    ax = jnp.abs(x)
    t = 1.0 / (1.0 + p * ax)
    poly = ((((a5 * t + a4) * t + a3) * t + a2) * t + a1) * t
    y = 1.0 - poly * jnp.exp(-ax * ax)
    return jnp.where(x >= 0.0, y, -y)


def _gelu(x):
    # exact (erf-based) GELU, matching torch.nn.GELU()
    return 0.5 * x * (1.0 + _erf_approx(x * _SQRT_HALF))


def _tap_masks(H, W):
    """Validity masks (1, H*W) for the 9 taps of a zero-padded 3x3 conv."""
    HW = H * W
    pos = jax.lax.broadcasted_iota(jnp.int32, (1, HW), 1)
    col = pos % W
    masks = []
    for dy in (-1, 0, 1):
        for dx in (-1, 0, 1):
            conds = []
            if dy == -1:
                conds.append(pos >= W)
            elif dy == 1:
                conds.append(pos < (H - 1) * W)
            if dx == -1:
                conds.append(col >= 1)
            elif dx == 1:
                conds.append(col <= W - 2)
            m = None
            for c in conds:
                m = c if m is None else jnp.logical_and(m, c)
            masks.append(m)          # None for the centre (0, 0) tap
    return masks


def _conv3x3_flat(x, w_t, b, masks, H, W):
    """3x3 conv, padding=1, on channels-major flattened activations.

    x: (Ci, H*W) lane-dense; w_t: (Co, 9*Ci) tap-major; b: (Co, 1).
    Returns (Co, H*W) f32 via a single im2col MXU matmul.
    """
    HW = H * W
    taps = []
    idx = 0
    for dy in (-1, 0, 1):
        for dx in (-1, 0, 1):
            off = dy * W + dx
            t = x if off == 0 else pltpu.roll(x, shift=(-off) % HW, axis=1)
            m = masks[idx]
            if m is not None:
                t = jnp.where(m, t, 0.0)          # zero padding via masking
            taps.append(t)
            idx += 1
    patches = jnp.concatenate(taps, axis=0)        # (9*Ci, H*W), tile-aligned
    return jnp.dot(w_t, patches, preferred_element_type=jnp.float32) + b


def _groupnorm1(h, beta_over_gamma, eps=1e-5):
    """GroupNorm(num_groups=1) with gamma pre-folded into the next conv:
    returns (h - mean) * rsqrt(var + eps) + beta/gamma.  One-pass statistics."""
    n = h.shape[0] * h.shape[1]
    s1 = jnp.sum(h, keepdims=True)                 # (1, 1)
    s2 = jnp.sum(h * h, keepdims=True)             # (1, 1)
    mean = s1 * (1.0 / n)
    var = s2 * (1.0 / n) - mean * mean
    return (h - mean) * jax.lax.rsqrt(var + eps) + beta_over_gamma


# --------------------------------- the kernel --------------------------------

def myblock_kernel(x_ref, cond_ref,
                   w_ds_ref, b_ds_ref,
                   w_c1_ref, b_c1_ref, bog1_ref,
                   w_c2_ref, b_c2_ref, bog2_ref,
                   w_res_ref, b_res_ref,
                   o_ref, *, H, W):
    x = x_ref[0]                                   # (Cin_p, H*W), lane-dense
    masks = _tap_masks(H, W)

    # h = ds_conv(x) + time_mlp(t_emb)[..., None, None]   (cond precomputed)
    h = _conv3x3_flat(x, w_ds_ref[...], b_ds_ref[...], masks, H, W)
    h = h + cond_ref[0]                            # (Co, 1) broadcast over H*W

    # conv = GN -> 3x3 conv (gamma folded into w_c1) -> GELU -> GN -> 3x3 conv
    h = _groupnorm1(h, bog1_ref[...])
    h = _conv3x3_flat(h, w_c1_ref[...], b_c1_ref[...], masks, H, W)
    h = _gelu(h)
    h = _groupnorm1(h, bog2_ref[...])
    h = _conv3x3_flat(h, w_c2_ref[...], b_c2_ref[...], masks, H, W)

    # + res_conv(x)   (1x1 conv == channel matmul)
    res = jnp.dot(w_res_ref[...], x, preferred_element_type=jnp.float32) \
        + b_res_ref[...]

    o_ref[0] = (h + res).astype(o_ref.dtype)       # (Co, H*W), lane-dense store


# --------------------------------- wrapper ------------------------------------

def _round_up(v, m):
    return ((v + m - 1) // m) * m


def myblock_forward(x, t_emb, params):
    """x: (B, Cin, H, W) NCHW (PyTorch layout), t_emb: (B, time_dim)."""
    B, Cin, H, W = x.shape
    HW = H * W
    Co = params["b_ds"].shape[0]
    Cm = params["b_c1"].shape[0]

    # ----- hoisted XLA preprocessing -----
    # time-MLP: Linear(GELU(t_emb)) once for the whole batch (exact erf GELU).
    cond = jax.nn.gelu(t_emb, approximate=False) @ params["w_t"] + params["b_t"]
    cond = cond.reshape(B, Co, 1)

    # pad input channels to a multiple of 8 so im2col sublane blocks are
    # tile-aligned (padded channels are zero and meet zero weight rows).
    Cin_p = _round_up(Cin, 8)
    x_flat = x.reshape(B, Cin, HW)
    w_ds = params["w_ds"]
    w_res = params["w_res"]
    if Cin_p != Cin:
        x_flat = jnp.pad(x_flat, ((0, 0), (0, Cin_p - Cin), (0, 0)))
        w_ds = jnp.pad(w_ds, ((0, 0), (0, 0), (0, Cin_p - Cin), (0, 0)))
        w_res = jnp.pad(w_res, ((0, Cin_p - Cin), (0, 0)))

    # conv weights -> 2-D (Co, 9*Ci) tap-major matrices; fold GN gamma into the
    # input-channel axis of the following conv (beta folding is NOT
    # padding-safe, so beta/gamma is applied in-kernel instead).
    w_ds_t = w_ds.reshape(9 * Cin_p, Co).T
    w_c1_t = (params["w_c1"] * params["g1"].reshape(1, 1, Co, 1)
              ).reshape(9 * Co, Cm).T
    w_c2_t = (params["w_c2"] * params["g2"].reshape(1, 1, Cm, 1)
              ).reshape(9 * Cm, Co).T
    w_res_t = w_res.T

    b_ds = params["b_ds"].reshape(Co, 1)
    b_c1 = params["b_c1"].reshape(Cm, 1)
    b_c2 = params["b_c2"].reshape(Co, 1)
    b_res = params["b_res"].reshape(Co, 1)
    bog1 = (params["be1"] / params["g1"]).reshape(Co, 1)
    bog2 = (params["be2"] / params["g2"]).reshape(Cm, 1)

    weights = [w_ds_t, b_ds, w_c1_t, b_c1, bog1, w_c2_t, b_c2, bog2,
               w_res_t, b_res]

    def full_spec(a):
        return pl.BlockSpec(a.shape, lambda b, n=a.ndim: (0,) * n)

    in_specs = [
        pl.BlockSpec((1, Cin_p, HW), lambda b: (b, 0, 0)),
        pl.BlockSpec((1, Co, 1), lambda b: (b, 0, 0)),
    ] + [full_spec(w) for w in weights]

    out = pl.pallas_call(
        functools.partial(myblock_kernel, H=H, W=W),
        out_shape=jax.ShapeDtypeStruct((B, Co, HW), jnp.float32),
        grid=(B,),
        in_specs=in_specs,
        out_specs=pl.BlockSpec((1, Co, HW), lambda b: (b, 0, 0)),
        compiler_params=pltpu.CompilerParams(
            dimension_semantics=("parallel",)),    # v7x: one sample per core
    )(x_flat, cond, *weights)

    return out.reshape(B, Co, H, W)                # NCHW, like the PyTorch module


# ------------------------------ parameter init -------------------------------

def init_params(key, in_ch, out_ch, time_dim, mult=1):
    cm = out_ch * mult
    ks = jax.random.split(key, 14)
    n = jax.random.normal
    return {
        "w_ds":  0.10 * n(ks[0], (3, 3, in_ch, out_ch), jnp.float32),
        "b_ds":  0.05 * n(ks[1], (out_ch,), jnp.float32),
        "w_t":   0.10 * n(ks[2], (time_dim, out_ch), jnp.float32),
        "b_t":   0.05 * n(ks[3], (out_ch,), jnp.float32),
        "g1":    1.0 + 0.10 * n(ks[4], (out_ch,), jnp.float32),
        "be1":   0.05 * n(ks[5], (out_ch,), jnp.float32),
        "w_c1":  0.10 * n(ks[6], (3, 3, out_ch, cm), jnp.float32),
        "b_c1":  0.05 * n(ks[7], (cm,), jnp.float32),
        "g2":    1.0 + 0.10 * n(ks[8], (cm,), jnp.float32),
        "be2":   0.05 * n(ks[9], (cm,), jnp.float32),
        "w_c2":  0.10 * n(ks[10], (3, 3, cm, out_ch), jnp.float32),
        "b_c2":  0.05 * n(ks[11], (out_ch,), jnp.float32),
        "w_res": 0.10 * n(ks[12], (in_ch, out_ch), jnp.float32),
        "b_res": 0.05 * n(ks[13], (out_ch,), jnp.float32),
    }


# ----------------------------- pure-JAX reference -----------------------------

def _ref_conv(x, w, b):
    y = jax.lax.conv_general_dilated(
        x, w, window_strides=(1, 1), padding="SAME",
        dimension_numbers=("NCHW", "HWIO", "NCHW"))
    return y + b.reshape(1, -1, 1, 1)


def _ref_gn(h, g, b, eps=1e-5):
    m = jnp.mean(h, axis=(1, 2, 3), keepdims=True)
    v = jnp.mean((h - m) ** 2, axis=(1, 2, 3), keepdims=True)
    return (h - m) * jax.lax.rsqrt(v + eps) * g.reshape(1, -1, 1, 1) \
        + b.reshape(1, -1, 1, 1)


def myblock_reference(x, t_emb, p):
    Cin = x.shape[1]
    Co = p["b_ds"].shape[0]
    h = _ref_conv(x, p["w_ds"], p["b_ds"])
    cond = jax.nn.gelu(t_emb, approximate=False) @ p["w_t"] + p["b_t"]
    h = h + cond[:, :, None, None]
    h = _ref_gn(h, p["g1"], p["be1"])
    h = _ref_conv(h, p["w_c1"], p["b_c1"])
    h = jax.nn.gelu(h, approximate=False)
    h = _ref_gn(h, p["g2"], p["be2"])
    h = _ref_conv(h, p["w_c2"], p["b_c2"])
    res = _ref_conv(x, p["w_res"].reshape(1, 1, Cin, Co), p["b_res"])
    return h + res


# ----------------------------------- main -------------------------------------

if __name__ == "__main__":
    B, in_ch, out_ch, time_dim, H, W, mult = 2, 4, 8, 32, 16, 16, 1

    key = jax.random.PRNGKey(0)
    kx, kt, kp = jax.random.split(key, 3)
    x = jax.random.normal(kx, (B, in_ch, H, W), jnp.float32)    # NCHW input
    t_emb = jax.random.normal(kt, (B, time_dim), jnp.float32)
    params = init_params(kp, in_ch, out_ch, time_dim, mult)

    fwd = jax.jit(myblock_forward)
    out = jax.block_until_ready(fwd(x, t_emb, params))

    ref = myblock_reference(x, t_emb, params)
    err = float(jnp.max(jnp.abs(out - ref)))
    if not jnp.allclose(out, ref, rtol=5e-4, atol=5e-4):
        raise AssertionError(f"kernel/reference mismatch, max abs err {err}")

    print("KERNEL_OK")
</pallas_src>

<mosaic_0001>
module attributes {stable_mosaic.version = 11 : i64} {
  func.func @myblock_kernel(%arg0: i32, %arg1: memref<1x8x256xf32, #tpu.memory_space<vmem>>, %arg2: memref<1x8x1xf32, #tpu.memory_space<vmem>>, %arg3: memref<8x72xf32, #tpu.memory_space<vmem>>, %arg4: memref<8x1xf32, #tpu.memory_space<vmem>>, %arg5: memref<8x72xf32, #tpu.memory_space<vmem>>, %arg6: memref<8x1xf32, #tpu.memory_space<vmem>>, %arg7: memref<8x1xf32, #tpu.memory_space<vmem>>, %arg8: memref<8x72xf32, #tpu.memory_space<vmem>>, %arg9: memref<8x1xf32, #tpu.memory_space<vmem>>, %arg10: memref<8x1xf32, #tpu.memory_space<vmem>>, %arg11: memref<8x8xf32, #tpu.memory_space<vmem>>, %arg12: memref<8x1xf32, #tpu.memory_space<vmem>>, %arg13: memref<1x8x256xf32, #tpu.memory_space<vmem>>) attributes {dimension_semantics = [#tpu.dimension_semantics<parallel>], iteration_bounds = array<i64: 2>, scalar_prefetch = 0 : i64, scratch_operands = 0 : i64, tpu.core_type = #tpu.core_type<tc>, window_params = [{transform_indices = @transform_0, window_bounds = array<i64: 1, 8, 256>}, {transform_indices = @transform_1, window_bounds = array<i64: 1, 8, 1>}, {pipeline_mode = #tpu.pipeline_mode<synchronous>, transform_indices = @transform_2, window_bounds = array<i64: 8, 72>}, {pipeline_mode = #tpu.pipeline_mode<synchronous>, transform_indices = @transform_3, window_bounds = array<i64: 8, 1>}, {pipeline_mode = #tpu.pipeline_mode<synchronous>, transform_indices = @transform_4, window_bounds = array<i64: 8, 72>}, {pipeline_mode = #tpu.pipeline_mode<synchronous>, transform_indices = @transform_5, window_bounds = array<i64: 8, 1>}, {pipeline_mode = #tpu.pipeline_mode<synchronous>, transform_indices = @transform_6, window_bounds = array<i64: 8, 1>}, {pipeline_mode = #tpu.pipeline_mode<synchronous>, transform_indices = @transform_7, window_bounds = array<i64: 8, 72>}, {pipeline_mode = #tpu.pipeline_mode<synchronous>, transform_indices = @transform_8, window_bounds = array<i64: 8, 1>}, {pipeline_mode = #tpu.pipeline_mode<synchronous>, transform_indices = @transform_9, window_bounds = array<i64: 8, 1>}, {pipeline_mode = #tpu.pipeline_mode<synchronous>, transform_indices = @transform_10, window_bounds = array<i64: 8, 8>}, {pipeline_mode = #tpu.pipeline_mode<synchronous>, transform_indices = @transform_11, window_bounds = array<i64: 8, 1>}, {transform_indices = @transform_12, window_bounds = array<i64: 1, 8, 256>}]} {
    %c0 = arith.constant 0 : index
    %c0_0 = arith.constant 0 : index
    %c0_1 = arith.constant 0 : index
    %0 = vector.load %arg1[%c0, %c0_0, %c0_1] : memref<1x8x256xf32, #tpu.memory_space<vmem>>, vector<1x8x256xf32>
    %1 = vector.shape_cast %0 : vector<1x8x256xf32> to vector<8x256xf32>
    %2 = tpu.iota {dimensions = array<i32: 1>} : vector<1x256xi32>
    %c16_i32 = arith.constant 16 : i32
    %c0_i32 = arith.constant 0 : i32
    %3 = arith.cmpi eq, %c16_i32, %c0_i32 : i32
    %c1_i32 = arith.constant 1 : i32
    %4 = arith.select %3, %c1_i32, %c16_i32 : i32
    %5 = vector.broadcast %4 : i32 to vector<1x256xi32>
    %6 = arith.remsi %2, %5 : vector<1x256xi32>
    %c0_i32_2 = arith.constant 0 : i32
    %7 = vector.broadcast %c0_i32_2 : i32 to vector<1x256xi32>
    %8 = arith.cmpi ne, %6, %7 : vector<1x256xi32>
    %c0_i32_3 = arith.constant 0 : i32
    %9 = vector.broadcast %c0_i32_3 : i32 to vector<1x256xi32>
    %10 = arith.cmpi slt, %6, %9 : vector<1x256xi32>
    %c0_i32_4 = arith.constant 0 : i32
    %11 = arith.cmpi slt, %4, %c0_i32_4 : i32
    %12 = vector.broadcast %11 : i1 to vector<1x256xi1>
    %13 = vector.broadcast %12 : vector<1x256xi1> to vector<1x256xi1>
    %14 = arith.xori %10, %13 : vector<1x256xi1>
    %15 = arith.andi %14, %8 : vector<1x256xi1>
    %16 = vector.broadcast %4 : i32 to vector<1x256xi32>
    %17 = arith.addi %6, %16 : vector<1x256xi32>
    %18 = arith.select %15, %17, %6 : vector<1x256xi1>, vector<1x256xi32>
    %c16_i32_5 = arith.constant 16 : i32
    %19 = vector.broadcast %c16_i32_5 : i32 to vector<1x256xi32>
    %20 = arith.cmpi sge, %2, %19 : vector<1x256xi32>
    %c1_i32_6 = arith.constant 1 : i32
    %21 = vector.broadcast %c1_i32_6 : i32 to vector<1x256xi32>
    %22 = arith.cmpi sge, %18, %21 : vector<1x256xi32>
    %23 = arith.andi %20, %22 : vector<1x256xi1>
    %c16_i32_7 = arith.constant 16 : i32
    %24 = vector.broadcast %c16_i32_7 : i32 to vector<1x256xi32>
    %25 = arith.cmpi sge, %2, %24 : vector<1x256xi32>
    %c16_i32_8 = arith.constant 16 : i32
    %26 = vector.broadcast %c16_i32_8 : i32 to vector<1x256xi32>
    %27 = arith.cmpi sge, %2, %26 : vector<1x256xi32>
    %c14_i32 = arith.constant 14 : i32
    %28 = vector.broadcast %c14_i32 : i32 to vector<1x256xi32>
    %29 = arith.cmpi sle, %18, %28 : vector<1x256xi32>
    %30 = arith.andi %27, %29 : vector<1x256xi1>
    %c1_i32_9 = arith.constant 1 : i32
    %31 = vector.broadcast %c1_i32_9 : i32 to vector<1x256xi32>
    %32 = arith.cmpi sge, %18, %31 : vector<1x256xi32>
    %c14_i32_10 = arith.constant 14 : i32
    %33 = vector.broadcast %c14_i32_10 : i32 to vector<1x256xi32>
    %34 = arith.cmpi sle, %18, %33 : vector<1x256xi32>
    %c240_i32 = arith.constant 240 : i32
    %35 = vector.broadcast %c240_i32 : i32 to vector<1x256xi32>
    %36 = arith.cmpi slt, %2, %35 : vector<1x256xi32>
    %c1_i32_11 = arith.constant 1 : i32
    %37 = vector.broadcast %c1_i32_11 : i32 to vector<1x256xi32>
    %38 = arith.cmpi sge, %18, %37 : vector<1x256xi32>
    %39 = arith.andi %36, %38 : vector<1x256xi1>
    %c240_i32_12 = arith.constant 240 : i32
    %40 = vector.broadcast %c240_i32_12 : i32 to vector<1x256xi32>
    %41 = arith.cmpi slt, %2, %40 : vector<1x256xi32>
    %c240_i32_13 = arith.constant 240 : i32
    %42 = vector.broadcast %c240_i32_13 : i32 to vector<1x256xi32>
    %43 = arith.cmpi slt, %2, %42 : vector<1x256xi32>
    %c14_i32_14 = arith.constant 14 : i32
    %44 = vector.broadcast %c14_i32_14 : i32 to vector<1x256xi32>
    %45 = arith.cmpi sle, %18, %44 : vector<1x256xi32>
    %46 = arith.andi %43, %45 : vector<1x256xi1>
    %c0_15 = arith.constant 0 : index
    %c0_16 = arith.constant 0 : index
    %47 = vector.load %arg3[%c0_15, %c0_16] : memref<8x72xf32, #tpu.memory_space<vmem>>, vector<8x72xf32>
    %c0_17 = arith.constant 0 : index
    %c0_18 = arith.constant 0 : index
    %48 = vector.load %arg4[%c0_17, %c0_18] : memref<8x1xf32, #tpu.memory_space<vmem>>, vector<8x1xf32>
    %c17_i32 = arith.constant 17 : i32
    %49 = tpu.dynamic_rotate %1 by %c17_i32 dim 1 : vector<8x256xf32>, i32 -> vector<8x256xf32>
    %cst = arith.constant 0.000000e+00 : f32
    %50 = vector.shape_cast %23 : vector<1x256xi1> to vector<1x256xi1>
    %51 = vector.broadcast %50 : vector<1x256xi1> to vector<8x256xi1>
    %52 = vector.broadcast %cst : f32 to vector<8x256xf32>
    %53 = arith.select %51, %49, %52 : vector<8x256xi1>, vector<8x256xf32>
    %c16_i32_19 = arith.constant 16 : i32
    %54 = tpu.dynamic_rotate %1 by %c16_i32_19 dim 1 : vector<8x256xf32>, i32 -> vector<8x256xf32>
    %cst_20 = arith.constant 0.000000e+00 : f32
    %55 = vector.shape_cast %25 : vector<1x256xi1> to vector<1x256xi1>
    %56 = vector.broadcast %55 : vector<1x256xi1> to vector<8x256xi1>
    %57 = vector.broadcast %cst_20 : f32 to vector<8x256xf32>
    %58 = arith.select %56, %54, %57 : vector<8x256xi1>, vector<8x256xf32>
    %c15_i32 = arith.constant 15 : i32
    %59 = tpu.dynamic_rotate %1 by %c15_i32 dim 1 : vector<8x256xf32>, i32 -> vector<8x256xf32>
    %cst_21 = arith.constant 0.000000e+00 : f32
    %60 = vector.shape_cast %30 : vector<1x256xi1> to vector<1x256xi1>
    %61 = vector.broadcast %60 : vector<1x256xi1> to vector<8x256xi1>
    %62 = vector.broadcast %cst_21 : f32 to vector<8x256xf32>
    %63 = arith.select %61, %59, %62 : vector<8x256xi1>, vector<8x256xf32>
    %c1_i32_22 = arith.constant 1 : i32
    %64 = tpu.dynamic_rotate %1 by %c1_i32_22 dim 1 : vector<8x256xf32>, i32 -> vector<8x256xf32>
    %cst_23 = arith.constant 0.000000e+00 : f32
    %65 = vector.shape_cast %32 : vector<1x256xi1> to vector<1x256xi1>
    %66 = vector.broadcast %65 : vector<1x256xi1> to vector<8x256xi1>
    %67 = vector.broadcast %cst_23 : f32 to vector<8x256xf32>
    %68 = arith.select %66, %64, %67 : vector<8x256xi1>, vector<8x256xf32>
    %c255_i32 = arith.constant 255 : i32
    %69 = tpu.dynamic_rotate %1 by %c255_i32 dim 1 : vector<8x256xf32>, i32 -> vector<8x256xf32>
    %cst_24 = arith.constant 0.000000e+00 : f32
    %70 = vector.shape_cast %34 : vector<1x256xi1> to vector<1x256xi1>
    %71 = vector.broadcast %70 : vector<1x256xi1> to vector<8x256xi1>
    %72 = vector.broadcast %cst_24 : f32 to vector<8x256xf32>
    %73 = arith.select %71, %69, %72 : vector<8x256xi1>, vector<8x256xf32>
    %c241_i32 = arith.constant 241 : i32
    %74 = tpu.dynamic_rotate %1 by %c241_i32 dim 1 : vector<8x256xf32>, i32 -> vector<8x256xf32>
    %cst_25 = arith.constant 0.000000e+00 : f32
    %75 = vector.shape_cast %39 : vector<1x256xi1> to vector<1x256xi1>
    %76 = vector.broadcast %75 : vector<1x256xi1> to vector<8x256xi1>
    %77 = vector.broadcast %cst_25 : f32 to vector<8x256xf32>
    %78 = arith.select %76, %74, %77 : vector<8x256xi1>, vector<8x256xf32>
    %c240_i32_26 = arith.constant 240 : i32
    %79 = tpu.dynamic_rotate %1 by %c240_i32_26 dim 1 : vector<8x256xf32>, i32 -> vector<8x256xf32>
    %cst_27 = arith.constant 0.000000e+00 : f32
    %80 = vector.shape_cast %41 : vector<1x256xi1> to vector<1x256xi1>
    %81 = vector.broadcast %80 : vector<1x256xi1> to vector<8x256xi1>
    %82 = vector.broadcast %cst_27 : f32 to vector<8x256xf32>
    %83 = arith.select %81, %79, %82 : vector<8x256xi1>, vector<8x256xf32>
    %c239_i32 = arith.constant 239 : i32
    %84 = tpu.dynamic_rotate %1 by %c239_i32 dim 1 : vector<8x256xf32>, i32 -> vector<8x256xf32>
    %cst_28 = arith.constant 0.000000e+00 : f32
    %85 = vector.shape_cast %46 : vector<1x256xi1> to vector<1x256xi1>
    %86 = vector.broadcast %85 : vector<1x256xi1> to vector<8x256xi1>
    %87 = vector.broadcast %cst_28 : f32 to vector<8x256xf32>
    %88 = arith.select %86, %84, %87 : vector<8x256xi1>, vector<8x256xf32>
    %89 = tpu.concatenate %53, %58, %63, %68, %1, %73, %78, %83, %88 in 0 : vector<8x256xf32>, vector<8x256xf32>, vector<8x256xf32>, vector<8x256xf32>, vector<8x256xf32>, vector<8x256xf32>, vector<8x256xf32>, vector<8x256xf32>, vector<8x256xf32> -> vector<72x256xf32>
    %cst_29 = arith.constant dense<0.000000e+00> : vector<8x256xf32>
    %90 = tpu.matmul %47, %89, %cst_29 {dimension_numbers = #tpu.dot_dimension_numbers<[1], [0], [0], [1], [0, 0, 1, 1], [], []>} : vector<8x72xf32>, vector<72x256xf32>, vector<8x256xf32> -> vector<8x256xf32>
    %91 = vector.broadcast %48 : vector<8x1xf32> to vector<8x256xf32>
    %92 = arith.addf %90, %91 : vector<8x256xf32>
    %c0_30 = arith.constant 0 : index
    %c0_31 = arith.constant 0 : index
    %c0_32 = arith.constant 0 : index
    %93 = vector.load %arg2[%c0_30, %c0_31, %c0_32] : memref<1x8x1xf32, #tpu.memory_space<vmem>>, vector<1x8x1xf32>
    %94 = vector.shape_cast %93 : vector<1x8x1xf32> to vector<8x1xf32>
    %95 = vector.broadcast %94 : vector<8x1xf32> to vector<8x256xf32>
    %96 = arith.addf %92, %95 : vector<8x256xf32>
    %c0_33 = arith.constant 0 : index
    %c0_34 = arith.constant 0 : index
    %97 = vector.load %arg7[%c0_33, %c0_34] : memref<8x1xf32, #tpu.memory_space<vmem>>, vector<8x1xf32>
    %98 = vector.shape_cast %96 : vector<8x256xf32> to vector<1x8x256xf32>
    %cst_35 = arith.constant dense<0.000000e+00> : vector<1xf32>
    %99 = vector.multi_reduction <add>, %98, %cst_35 [1, 2] : vector<1x8x256xf32> to vector<1xf32>
    %100 = vector.shape_cast %99 : vector<1xf32> to vector<1x1x1xf32>
    %101 = vector.extract %100[0, 0, 0] : f32 from vector<1x1x1xf32>
    %102 = vector.broadcast %101 : f32 to vector<1x1xf32>
    %103 = arith.mulf %96, %96 : vector<8x256xf32>
    %104 = vector.shape_cast %103 : vector<8x256xf32> to vector<1x8x256xf32>
    %cst_36 = arith.constant dense<0.000000e+00> : vector<1xf32>
    %105 = vector.multi_reduction <add>, %104, %cst_36 [1, 2] : vector<1x8x256xf32> to vector<1xf32>
    %106 = vector.shape_cast %105 : vector<1xf32> to vector<1x1x1xf32>
    %107 = vector.extract %106[0, 0, 0] : f32 from vector<1x1x1xf32>
    %108 = vector.broadcast %107 : f32 to vector<1x1xf32>
    %cst_37 = arith.constant 4.8828125E-4 : f32
    %109 = vector.broadcast %cst_37 : f32 to vector<1x1xf32>
    %110 = arith.mulf %102, %109 : vector<1x1xf32>
    %cst_38 = arith.constant 4.8828125E-4 : f32
    %111 = vector.broadcast %cst_38 : f32 to vector<1x1xf32>
    %112 = arith.mulf %108, %111 : vector<1x1xf32>
    %113 = arith.mulf %110, %110 : vector<1x1xf32>
    %114 = arith.subf %112, %113 : vector<1x1xf32>
    %115 = vector.broadcast %110 : vector<1x1xf32> to vector<8x256xf32>
    %116 = arith.subf %96, %115 : vector<8x256xf32>
    %cst_39 = arith.constant 9.99999974E-6 : f32
    %117 = vector.broadcast %cst_39 : f32 to vector<1x1xf32>
    %118 = arith.addf %114, %117 : vector<1x1xf32>
    %119 = math.rsqrt %118 : vector<1x1xf32>
    %120 = vector.broadcast %119 : vector<1x1xf32> to vector<8x256xf32>
    %121 = arith.mulf %116, %120 : vector<8x256xf32>
    %122 = vector.broadcast %97 : vector<8x1xf32> to vector<8x256xf32>
    %123 = arith.addf %121, %122 : vector<8x256xf32>
    %c0_40 = arith.constant 0 : index
    %c0_41 = arith.constant 0 : index
    %124 = vector.load %arg5[%c0_40, %c0_41] : memref<8x72xf32, #tpu.memory_space<vmem>>, vector<8x72xf32>
    %c0_42 = arith.constant 0 : index
    %c0_43 = arith.constant 0 : index
    %125 = vector.load %arg6[%c0_42, %c0_43] : memref<8x1xf32, #tpu.memory_space<vmem>>, vector<8x1xf32>
    %c17_i32_44 = arith.constant 17 : i32
    %126 = tpu.dynamic_rotate %123 by %c17_i32_44 dim 1 : vector<8x256xf32>, i32 -> vector<8x256xf32>
    %cst_45 = arith.constant 0.000000e+00 : f32
    %127 = vector.shape_cast %23 : vector<1x256xi1> to vector<1x256xi1>
    %128 = vector.broadcast %127 : vector<1x256xi1> to vector<8x256xi1>
    %129 = vector.broadcast %cst_45 : f32 to vector<8x256xf32>
    %130 = arith.select %128, %126, %129 : vector<8x256xi1>, vector<8x256xf32>
    %c16_i32_46 = arith.constant 16 : i32
    %131 = tpu.dynamic_rotate %123 by %c16_i32_46 dim 1 : vector<8x256xf32>, i32 -> vector<8x256xf32>
    %cst_47 = arith.constant 0.000000e+00 : f32
    %132 = vector.shape_cast %25 : vector<1x256xi1> to vector<1x256xi1>
    %133 = vector.broadcast %132 : vector<1x256xi1> to vector<8x256xi1>
    %134 = vector.broadcast %cst_47 : f32 to vector<8x256xf32>
    %135 = arith.select %133, %131, %134 : vector<8x256xi1>, vector<8x256xf32>
    %c15_i32_48 = arith.constant 15 : i32
    %136 = tpu.dynamic_rotate %123 by %c15_i32_48 dim 1 : vector<8x256xf32>, i32 -> vector<8x256xf32>
    %cst_49 = arith.constant 0.000000e+00 : f32
    %137 = vector.shape_cast %30 : vector<1x256xi1> to vector<1x256xi1>
    %138 = vector.broadcast %137 : vector<1x256xi1> to vector<8x256xi1>
    %139 = vector.broadcast %cst_49 : f32 to vector<8x256xf32>
    %140 = arith.select %138, %136, %139 : vector<8x256xi1>, vector<8x256xf32>
    %c1_i32_50 = arith.constant 1 : i32
    %141 = tpu.dynamic_rotate %123 by %c1_i32_50 dim 1 : vector<8x256xf32>, i32 -> vector<8x256xf32>
    %cst_51 = arith.constant 0.000000e+00 : f32
    %142 = vector.shape_cast %32 : vector<1x256xi1> to vector<1x256xi1>
    %143 = vector.broadcast %142 : vector<1x256xi1> to vector<8x256xi1>
    %144 = vector.broadcast %cst_51 : f32 to vector<8x256xf32>
    %145 = arith.select %143, %141, %144 : vector<8x256xi1>, vector<8x256xf32>
    %c255_i32_52 = arith.constant 255 : i32
    %146 = tpu.dynamic_rotate %123 by %c255_i32_52 dim 1 : vector<8x256xf32>, i32 -> vector<8x256xf32>
    %cst_53 = arith.constant 0.000000e+00 : f32
    %147 = vector.shape_cast %34 : vector<1x256xi1> to vector<1x256xi1>
    %148 = vector.broadcast %147 : vector<1x256xi1> to vector<8x256xi1>
    %149 = vector.broadcast %cst_53 : f32 to vector<8x256xf32>
    %150 = arith.select %148, %146, %149 : vector<8x256xi1>, vector<8x256xf32>
    %c241_i32_54 = arith.constant 241 : i32
    %151 = tpu.dynamic_rotate %123 by %c241_i32_54 dim 1 : vector<8x256xf32>, i32 -> vector<8x256xf32>
    %cst_55 = arith.constant 0.000000e+00 : f32
    %152 = vector.shape_cast %39 : vector<1x256xi1> to vector<1x256xi1>
    %153 = vector.broadcast %152 : vector<1x256xi1> to vector<8x256xi1>
    %154 = vector.broadcast %cst_55 : f32 to vector<8x256xf32>
    %155 = arith.select %153, %151, %154 : vector<8x256xi1>, vector<8x256xf32>
    %c240_i32_56 = arith.constant 240 : i32
    %156 = tpu.dynamic_rotate %123 by %c240_i32_56 dim 1 : vector<8x256xf32>, i32 -> vector<8x256xf32>
    %cst_57 = arith.constant 0.000000e+00 : f32
    %157 = vector.shape_cast %41 : vector<1x256xi1> to vector<1x256xi1>
    %158 = vector.broadcast %157 : vector<1x256xi1> to vector<8x256xi1>
    %159 = vector.broadcast %cst_57 : f32 to vector<8x256xf32>
    %160 = arith.select %158, %156, %159 : vector<8x256xi1>, vector<8x256xf32>
    %c239_i32_58 = arith.constant 239 : i32
    %161 = tpu.dynamic_rotate %123 by %c239_i32_58 dim 1 : vector<8x256xf32>, i32 -> vector<8x256xf32>
    %cst_59 = arith.constant 0.000000e+00 : f32
    %162 = vector.shape_cast %46 : vector<1x256xi1> to vector<1x256xi1>
    %163 = vector.broadcast %162 : vector<1x256xi1> to vector<8x256xi1>
    %164 = vector.broadcast %cst_59 : f32 to vector<8x256xf32>
    %165 = arith.select %163, %161, %164 : vector<8x256xi1>, vector<8x256xf32>
    %166 = tpu.concatenate %130, %135, %140, %145, %123, %150, %155, %160, %165 in 0 : vector<8x256xf32>, vector<8x256xf32>, vector<8x256xf32>, vector<8x256xf32>, vector<8x256xf32>, vector<8x256xf32>, vector<8x256xf32>, vector<8x256xf32>, vector<8x256xf32> -> vector<72x256xf32>
    %cst_60 = arith.constant dense<0.000000e+00> : vector<8x256xf32>
    %167 = tpu.matmul %124, %166, %cst_60 {dimension_numbers = #tpu.dot_dimension_numbers<[1], [0], [0], [1], [0, 0, 1, 1], [], []>} : vector<8x72xf32>, vector<72x256xf32>, vector<8x256xf32> -> vector<8x256xf32>
    %168 = vector.broadcast %125 : vector<8x1xf32> to vector<8x256xf32>
    %169 = arith.addf %167, %168 : vector<8x256xf32>
    %cst_61 = arith.constant 5.000000e-01 : f32
    %170 = vector.broadcast %cst_61 : f32 to vector<8x256xf32>
    %171 = arith.mulf %170, %169 : vector<8x256xf32>
    %cst_62 = arith.constant 0.707106769 : f32
    %172 = vector.broadcast %cst_62 : f32 to vector<8x256xf32>
    %173 = arith.mulf %169, %172 : vector<8x256xf32>
    %174 = math.absf %173 : vector<8x256xf32>
    %cst_63 = arith.constant 0.327591091 : f32
    %175 = vector.broadcast %cst_63 : f32 to vector<8x256xf32>
    %176 = arith.mulf %175, %174 : vector<8x256xf32>
    %cst_64 = arith.constant 1.000000e+00 : f32
    %177 = vector.broadcast %cst_64 : f32 to vector<8x256xf32>
    %178 = arith.addf %177, %176 : vector<8x256xf32>
    %cst_65 = arith.constant 1.000000e+00 : f32
    %179 = vector.broadcast %cst_65 : f32 to vector<8x256xf32>
    %180 = arith.divf %179, %178 : vector<8x256xf32>
    %cst_66 = arith.constant 1.06140542 : f32
    %181 = vector.broadcast %cst_66 : f32 to vector<8x256xf32>
    %182 = arith.mulf %181, %180 : vector<8x256xf32>
    %cst_67 = arith.constant -1.45315206 : f32
    %183 = vector.broadcast %cst_67 : f32 to vector<8x256xf32>
    %184 = arith.addf %182, %183 : vector<8x256xf32>
    %185 = arith.mulf %184, %180 : vector<8x256xf32>
    %cst_68 = arith.constant 1.42141378 : f32
    %186 = vector.broadcast %cst_68 : f32 to vector<8x256xf32>
    %187 = arith.addf %185, %186 : vector<8x256xf32>
    %188 = arith.mulf %187, %180 : vector<8x256xf32>
    %cst_69 = arith.constant -0.284496725 : f32
    %189 = vector.broadcast %cst_69 : f32 to vector<8x256xf32>
    %190 = arith.addf %188, %189 : vector<8x256xf32>
    %191 = arith.mulf %190, %180 : vector<8x256xf32>
    %cst_70 = arith.constant 0.254829586 : f32
    %192 = vector.broadcast %cst_70 : f32 to vector<8x256xf32>
    %193 = arith.addf %191, %192 : vector<8x256xf32>
    %194 = arith.mulf %193, %180 : vector<8x256xf32>
    %cst_71 = arith.constant 0.000000e+00 : f32
    %195 = vector.broadcast %cst_71 : f32 to vector<8x256xf32>
    %196 = arith.subf %195, %174 : vector<8x256xf32>
    %197 = arith.mulf %196, %174 : vector<8x256xf32>
    %198 = math.exp %197 : vector<8x256xf32>
    %199 = arith.mulf %194, %198 : vector<8x256xf32>
    %cst_72 = arith.constant 1.000000e+00 : f32
    %200 = vector.broadcast %cst_72 : f32 to vector<8x256xf32>
    %201 = arith.subf %200, %199 : vector<8x256xf32>
    %cst_73 = arith.constant 0.000000e+00 : f32
    %202 = vector.broadcast %cst_73 : f32 to vector<8x256xf32>
    %203 = arith.cmpf oge, %173, %202 : vector<8x256xf32>
    %cst_74 = arith.constant 0.000000e+00 : f32
    %204 = vector.broadcast %cst_74 : f32 to vector<8x256xf32>
    %205 = arith.subf %204, %201 : vector<8x256xf32>
    %206 = arith.select %203, %201, %205 : vector<8x256xi1>, vector<8x256xf32>
    %cst_75 = arith.constant 1.000000e+00 : f32
    %207 = vector.broadcast %cst_75 : f32 to vector<8x256xf32>
    %208 = arith.addf %207, %206 : vector<8x256xf32>
    %209 = arith.mulf %171, %208 : vector<8x256xf32>
    %c0_76 = arith.constant 0 : index
    %c0_77 = arith.constant 0 : index
    %210 = vector.load %arg10[%c0_76, %c0_77] : memref<8x1xf32, #tpu.memory_space<vmem>>, vector<8x1xf32>
    %211 = vector.shape_cast %209 : vector<8x256xf32> to vector<1x8x256xf32>
    %cst_78 = arith.constant dense<0.000000e+00> : vector<1xf32>
    %212 = vector.multi_reduction <add>, %211, %cst_78 [1, 2] : vector<1x8x256xf32> to vector<1xf32>
    %213 = vector.shape_cast %212 : vector<1xf32> to vector<1x1x1xf32>
    %214 = vector.extract %213[0, 0, 0] : f32 from vector<1x1x1xf32>
    %215 = vector.broadcast %214 : f32 to vector<1x1xf32>
    %216 = arith.mulf %209, %209 : vector<8x256xf32>
    %217 = vector.shape_cast %216 : vector<8x256xf32> to vector<1x8x256xf32>
    %cst_79 = arith.constant dense<0.000000e+00> : vector<1xf32>
    %218 = vector.multi_reduction <add>, %217, %cst_79 [1, 2] : vector<1x8x256xf32> to vector<1xf32>
    %219 = vector.shape_cast %218 : vector<1xf32> to vector<1x1x1xf32>
    %220 = vector.extract %219[0, 0, 0] : f32 from vector<1x1x1xf32>
    %221 = vector.broadcast %220 : f32 to vector<1x1xf32>
    %cst_80 = arith.constant 4.8828125E-4 : f32
    %222 = vector.broadcast %cst_80 : f32 to vector<1x1xf32>
    %223 = arith.mulf %215, %222 : vector<1x1xf32>
    %cst_81 = arith.constant 4.8828125E-4 : f32
    %224 = vector.broadcast %cst_81 : f32 to vector<1x1xf32>
    %225 = arith.mulf %221, %224 : vector<1x1xf32>
    %226 = arith.mulf %223, %223 : vector<1x1xf32>
    %227 = arith.subf %225, %226 : vector<1x1xf32>
    %228 = vector.broadcast %223 : vector<1x1xf32> to vector<8x256xf32>
    %229 = arith.subf %209, %228 : vector<8x256xf32>
    %cst_82 = arith.constant 9.99999974E-6 : f32
    %230 = vector.broadcast %cst_82 : f32 to vector<1x1xf32>
    %231 = arith.addf %227, %230 : vector<1x1xf32>
    %232 = math.rsqrt %231 : vector<1x1xf32>
    %233 = vector.broadcast %232 : vector<1x1xf32> to vector<8x256xf32>
    %234 = arith.mulf %229, %233 : vector<8x256xf32>
    %235 = vector.broadcast %210 : vector<8x1xf32> to vector<8x256xf32>
    %236 = arith.addf %234, %235 : vector<8x256xf32>
    %c0_83 = arith.constant 0 : index
    %c0_84 = arith.constant 0 : index
    %237 = vector.load %arg8[%c0_83, %c0_84] : memref<8x72xf32, #tpu.memory_space<vmem>>, vector<8x72xf32>
    %c0_85 = arith.constant 0 : index
    %c0_86 = arith.constant 0 : index
    %238 = vector.load %arg9[%c0_85, %c0_86] : memref<8x1xf32, #tpu.memory_space<vmem>>, vector<8x1xf32>
    %c17_i32_87 = arith.constant 17 : i32
    %239 = tpu.dynamic_rotate %236 by %c17_i32_87 dim 1 : vector<8x256xf32>, i32 -> vector<8x256xf32>
    %cst_88 = arith.constant 0.000000e+00 : f32
    %240 = vector.shape_cast %23 : vector<1x256xi1> to vector<1x256xi1>
    %241 = vector.broadcast %240 : vector<1x256xi1> to vector<8x256xi1>
    %242 = vector.broadcast %cst_88 : f32 to vector<8x256xf32>
    %243 = arith.select %241, %239, %242 : vector<8x256xi1>, vector<8x256xf32>
    %c16_i32_89 = arith.constant 16 : i32
    %244 = tpu.dynamic_rotate %236 by %c16_i32_89 dim 1 : vector<8x256xf32>, i32 -> vector<8x256xf32>
    %cst_90 = arith.constant 0.000000e+00 : f32
    %245 = vector.shape_cast %25 : vector<1x256xi1> to vector<1x256xi1>
    %246 = vector.broadcast %245 : vector<1x256xi1> to vector<8x256xi1>
    %247 = vector.broadcast %cst_90 : f32 to vector<8x256xf32>
    %248 = arith.select %246, %244, %247 : vector<8x256xi1>, vector<8x256xf32>
    %c15_i32_91 = arith.constant 15 : i32
    %249 = tpu.dynamic_rotate %236 by %c15_i32_91 dim 1 : vector<8x256xf32>, i32 -> vector<8x256xf32>
    %cst_92 = arith.constant 0.000000e+00 : f32
    %250 = vector.shape_cast %30 : vector<1x256xi1> to vector<1x256xi1>
    %251 = vector.broadcast %250 : vector<1x256xi1> to vector<8x256xi1>
    %252 = vector.broadcast %cst_92 : f32 to vector<8x256xf32>
    %253 = arith.select %251, %249, %252 : vector<8x256xi1>, vector<8x256xf32>
    %c1_i32_93 = arith.constant 1 : i32
    %254 = tpu.dynamic_rotate %236 by %c1_i32_93 dim 1 : vector<8x256xf32>, i32 -> vector<8x256xf32>
    %cst_94 = arith.constant 0.000000e+00 : f32
    %255 = vector.shape_cast %32 : vector<1x256xi1> to vector<1x256xi1>
    %256 = vector.broadcast %255 : vector<1x256xi1> to vector<8x256xi1>
    %257 = vector.broadcast %cst_94 : f32 to vector<8x256xf32>
    %258 = arith.select %256, %254, %257 : vector<8x256xi1>, vector<8x256xf32>
    %c255_i32_95 = arith.constant 255 : i32
    %259 = tpu.dynamic_rotate %236 by %c255_i32_95 dim 1 : vector<8x256xf32>, i32 -> vector<8x256xf32>
    %cst_96 = arith.constant 0.000000e+00 : f32
    %260 = vector.shape_cast %34 : vector<1x256xi1> to vector<1x256xi1>
    %261 = vector.broadcast %260 : vector<1x256xi1> to vector<8x256xi1>
    %262 = vector.broadcast %cst_96 : f32 to vector<8x256xf32>
    %263 = arith.select %261, %259, %262 : vector<8x256xi1>, vector<8x256xf32>
    %c241_i32_97 = arith.constant 241 : i32
    %264 = tpu.dynamic_rotate %236 by %c241_i32_97 dim 1 : vector<8x256xf32>, i32 -> vector<8x256xf32>
    %cst_98 = arith.constant 0.000000e+00 : f32
    %265 = vector.shape_cast %39 : vector<1x256xi1> to vector<1x256xi1>
    %266 = vector.broadcast %265 : vector<1x256xi1> to vector<8x256xi1>
    %267 = vector.broadcast %cst_98 : f32 to vector<8x256xf32>
    %268 = arith.select %266, %264, %267 : vector<8x256xi1>, vector<8x256xf32>
    %c240_i32_99 = arith.constant 240 : i32
    %269 = tpu.dynamic_rotate %236 by %c240_i32_99 dim 1 : vector<8x256xf32>, i32 -> vector<8x256xf32>
    %cst_100 = arith.constant 0.000000e+00 : f32
    %270 = vector.shape_cast %41 : vector<1x256xi1> to vector<1x256xi1>
    %271 = vector.broadcast %270 : vector<1x256xi1> to vector<8x256xi1>
    %272 = vector.broadcast %cst_100 : f32 to vector<8x256xf32>
    %273 = arith.select %271, %269, %272 : vector<8x256xi1>, vector<8x256xf32>
    %c239_i32_101 = arith.constant 239 : i32
    %274 = tpu.dynamic_rotate %236 by %c239_i32_101 dim 1 : vector<8x256xf32>, i32 -> vector<8x256xf32>
    %cst_102 = arith.constant 0.000000e+00 : f32
    %275 = vector.shape_cast %46 : vector<1x256xi1> to vector<1x256xi1>
    %276 = vector.broadcast %275 : vector<1x256xi1> to vector<8x256xi1>
    %277 = vector.broadcast %cst_102 : f32 to vector<8x256xf32>
    %278 = arith.select %276, %274, %277 : vector<8x256xi1>, vector<8x256xf32>
    %279 = tpu.concatenate %243, %248, %253, %258, %236, %263, %268, %273, %278 in 0 : vector<8x256xf32>, vector<8x256xf32>, vector<8x256xf32>, vector<8x256xf32>, vector<8x256xf32>, vector<8x256xf32>, vector<8x256xf32>, vector<8x256xf32>, vector<8x256xf32> -> vector<72x256xf32>
    %cst_103 = arith.constant dense<0.000000e+00> : vector<8x256xf32>
    %280 = tpu.matmul %237, %279, %cst_103 {dimension_numbers = #tpu.dot_dimension_numbers<[1], [0], [0], [1], [0, 0, 1, 1], [], []>} : vector<8x72xf32>, vector<72x256xf32>, vector<8x256xf32> -> vector<8x256xf32>
    %281 = vector.broadcast %238 : vector<8x1xf32> to vector<8x256xf32>
    %282 = arith.addf %280, %281 : vector<8x256xf32>
    %c0_104 = arith.constant 0 : index
    %c0_105 = arith.constant 0 : index
    %283 = vector.load %arg11[%c0_104, %c0_105] : memref<8x8xf32, #tpu.memory_space<vmem>>, vector<8x8xf32>
    %cst_106 = arith.constant dense<0.000000e+00> : vector<8x256xf32>
    %284 = tpu.matmul %283, %1, %cst_106 {dimension_numbers = #tpu.dot_dimension_numbers<[1], [0], [0], [1], [0, 0, 1, 1], [], []>} : vector<8x8xf32>, vector<8x256xf32>, vector<8x256xf32> -> vector<8x256xf32>
    %c0_107 = arith.constant 0 : index
    %c0_108 = arith.constant 0 : index
    %285 = vector.load %arg12[%c0_107, %c0_108] : memref<8x1xf32, #tpu.memory_space<vmem>>, vector<8x1xf32>
    %286 = vector.broadcast %285 : vector<8x1xf32> to vector<8x256xf32>
    %287 = arith.addf %284, %286 : vector<8x256xf32>
    %288 = arith.addf %282, %287 : vector<8x256xf32>
    %c0_109 = arith.constant 0 : index
    %c0_110 = arith.constant 0 : index
    %c0_111 = arith.constant 0 : index
    %289 = vector.load %arg13[%c0_109, %c0_110, %c0_111] : memref<1x8x256xf32, #tpu.memory_space<vmem>>, vector<1x8x256xf32>
    %290 = vector.shape_cast %289 : vector<1x8x256xf32> to vector<8x256xf32>
    %291 = vector.shape_cast %288 : vector<8x256xf32> to vector<1x8x256xf32>
    tpu.vector_store %arg13[%c0_109, %c0_110, %c0_111], %291 {strides = array<i32>} : memref<1x8x256xf32, #tpu.memory_space<vmem>>, vector<1x8x256xf32>,
    return
  }
  func.func @transform_0(%arg0: i32) -> (i32, i32, i32) {
    %c0_i32 = arith.constant 0 : i32
    %c0_i32_0 = arith.constant 0 : i32
    %c0_i32_1 = arith.constant 0 : i32
    return %arg0, %c0_i32, %c0_i32_0 : i32, i32, i32
  }
  func.func @transform_1(%arg0: i32) -> (i32, i32, i32) {
    %c0_i32 = arith.constant 0 : i32
    %c0_i32_0 = arith.constant 0 : i32
    %c0_i32_1 = arith.constant 0 : i32
    return %arg0, %c0_i32, %c0_i32_0 : i32, i32, i32
  }
  func.func @transform_2(%arg0: i32) -> (i32, i32) {
    %c0_i32 = arith.constant 0 : i32
    %c0_i32_0 = arith.constant 0 : i32
    %c0_i32_1 = arith.constant 0 : i32
    return %c0_i32, %c0_i32_0 : i32, i32
  }
  func.func @transform_3(%arg0: i32) -> (i32, i32) {
    %c0_i32 = arith.constant 0 : i32
    %c0_i32_0 = arith.constant 0 : i32
    %c0_i32_1 = arith.constant 0 : i32
    return %c0_i32, %c0_i32_0 : i32, i32
  }
  func.func @transform_4(%arg0: i32) -> (i32, i32) {
    %c0_i32 = arith.constant 0 : i32
    %c0_i32_0 = arith.constant 0 : i32
    %c0_i32_1 = arith.constant 0 : i32
    return %c0_i32, %c0_i32_0 : i32, i32
  }
  func.func @transform_5(%arg0: i32) -> (i32, i32) {
    %c0_i32 = arith.constant 0 : i32
    %c0_i32_0 = arith.constant 0 : i32
    %c0_i32_1 = arith.constant 0 : i32
    return %c0_i32, %c0_i32_0 : i32, i32
  }
  func.func @transform_6(%arg0: i32) -> (i32, i32) {
    %c0_i32 = arith.constant 0 : i32
    %c0_i32_0 = arith.constant 0 : i32
    %c0_i32_1 = arith.constant 0 : i32
    return %c0_i32, %c0_i32_0 : i32, i32
  }
  func.func @transform_7(%arg0: i32) -> (i32, i32) {
    %c0_i32 = arith.constant 0 : i32
    %c0_i32_0 = arith.constant 0 : i32
    %c0_i32_1 = arith.constant 0 : i32
    return %c0_i32, %c0_i32_0 : i32, i32
  }
  func.func @transform_8(%arg0: i32) -> (i32, i32) {
    %c0_i32 = arith.constant 0 : i32
    %c0_i32_0 = arith.constant 0 : i32
    %c0_i32_1 = arith.constant 0 : i32
    return %c0_i32, %c0_i32_0 : i32, i32
  }
  func.func @transform_9(%arg0: i32) -> (i32, i32) {
    %c0_i32 = arith.constant 0 : i32
    %c0_i32_0 = arith.constant 0 : i32
    %c0_i32_1 = arith.constant 0 : i32
    return %c0_i32, %c0_i32_0 : i32, i32
  }
  func.func @transform_10(%arg0: i32) -> (i32, i32) {
    %c0_i32 = arith.constant 0 : i32
    %c0_i32_0 = arith.constant 0 : i32
    %c0_i32_1 = arith.constant 0 : i32
    return %c0_i32, %c0_i32_0 : i32, i32
  }
  func.func @transform_11(%arg0: i32) -> (i32, i32) {
    %c0_i32 = arith.constant 0 : i32
    %c0_i32_0 = arith.constant 0 : i32
    %c0_i32_1 = arith.constant 0 : i32
    return %c0_i32, %c0_i32_0 : i32, i32
  }
  func.func @transform_12(%arg0: i32) -> (i32, i32, i32) {
    %c0_i32 = arith.constant 0 : i32
    %c0_i32_0 = arith.constant 0 : i32
    %c0_i32_1 = arith.constant 0 : i32
    return %arg0, %c0_i32, %c0_i32_0 : i32, i32, i32
  }
}

</mosaic_0001>

<bundles_post_ra>
// kernel: myblock_forward.1
= control target key start
LH: loop header
LB: loop body
LE: loop exit
PB: predicated region body
PF: predicated region fallthrough
CT: control target
= control target key end

     0   :  { %s1434_s21 = smov 0   ;;  %s1816_s0 = inlined_call_operand.vmem [shape: f32[2,8,256], index: 0, kind: input, shape index: {}]   ;;  %s1817_s1 = inlined_call_operand.vmem [shape: f32[2,8,1], index: 1, kind: input, shape index: {}]   ;;  %s1818_s2 = inlined_call_operand.vmem [shape: f32[8,72], index: 2, kind: input, shape index: {}]   ;;  %s1819_s3 = inlined_call_operand.vmem [shape: f32[8,1], index: 3, kind: input, shape index: {}]   ;;  %s1820_s4 = inlined_call_operand.vmem [shape: f32[8,72], index: 4, kind: input, shape index: {}]   ;;  %s1821_s5 = inlined_call_operand.vmem [shape: f32[8,1], index: 5, kind: input, shape index: {}]   ;;  %s1822_s6 = inlined_call_operand.vmem [shape: f32[8,1], index: 6, kind: input, shape index: {}]   ;;  %s1823_s7 = inlined_call_operand.vmem [shape: f32[8,72], index: 7, kind: input, shape index: {}]   ;;  %s1824_s8 = inlined_call_operand.vmem [shape: f32[8,1], index: 8, kind: input, shape index: {}]   ;;  %s1825_s9 = inlined_call_operand.vmem [shape: f32[8,1], index: 9, kind: input, shape index: {}]   ;;  %s1826_s10 = inlined_call_operand.vmem [shape: f32[8,8], index: 10, kind: input, shape index: {}]   ;;  %s1827_s11 = inlined_call_operand.vmem [shape: f32[8,1], index: 11, kind: input, shape index: {}]   ;;  %s1828_s12 = inlined_call_operand.vmem [shape: f32[2,8,256], index: 12, kind: output, shape index: {}]  }
   0x1 LB: > { %s1251_s22 = sadd.s32 4294967295, %s1357_s21   ;;  %p1255_p0 = scmp.ge.s32.totalorder %s1357_s21, 1  ;;  %s1357_s21 = sphi %s1434_s21, %s22_s21  }
   0x2   : > { %p371_p1 = scmp.lt.s32.totalorder %s1357_s21, 3 }
   0x4   : > { %p372_p2 = pnand %p1255_p0, %p371_p1 }
   0x5   : > { %p417_p3 = scmp.lt.s32.totalorder (!%p372_p2), %s1251_s22, 1  ;;  %s1359_s27 = smov (!%p372_p2), 112  }
   0x6   : > { %375 = sbr.rel (%p372_p2) target bundleno = 1566 (0x61e), region = 68  ;;  %s1360_s28 = smov (!%p372_p2), 111  }
   0x7   : > { %s1361_s29 = smov (!%p372_p2), 113   ;;  %s1362_s30 = smov (!%p372_p2), 127  }
   0x8   : > { %s1363_s13 = smov (!%p372_p2), 1   ;;  %s1366_s14 = smov (!%p372_p2), 15  }
   0x9   : > { %s1367_s16 = smov (!%p372_p2), 16   ;;  %s1368_s20 = smov (!%p372_p2), 17  }
   0xb   : > { %s1872_s22 = smov (!%p417_p3, %s1251_s22), 1  ;;  %v1364_v2 = vmov 0.0   ;;  %v1365_v3 = vmov 0   ;;  %v477_v4 = vld [vmem:[%s1819_s3] sm:$0xff]  ;;  %v433_v6 = vlaneseq }
   0xc   : > { %s1309_s23 = sshll.u32 %s1872_s22, 4  ;;  %655 = vmatprep.mubr.f32.mxu0 %v1364_v2  ;;  %850 = vmatprep.mubr.f32.mxu1 %v1364_v2  ;;  %s1258_s15 = sshll.u32 %s1872_s22, 3  ;;  %v476_v51 = vld [vmem:[%s1818_s2] sm:$0xff] }
   0xd   : > { %s421_s26 = scalar_lea.vmem %s1816_s0, %s1309_s23  ;;  %1337 = vset.pattern.permute.xlu0 %v1365_v3  ;;  %1338 = vset.pattern.permute.xlu1 %v1365_v3  ;;  %s425_s19 = scalar_lea.vmem %s1817_s1, %s1258_s15  ;;  %v1495_v7 = vand.u32 127, %v433_v6  ;;  %v670_v3 = vld [vmem:[%s1822_s6] sm:$0xff] }
   0xe   : > { %v1450_v0 = vld [vmem:[%s421_s26] sm:$0xff]  ;;  %v1456_v1 = vld [vmem:[%s421_s26 + $0x8] sm:$0xff] }
   0xf   : > { %556 = vrot.lane.b32.xlu1 %v1450_v0, %s1359_s27  ;;  %569 = vrot.lane.b32.xlu0 %v1450_v0, %s1360_s28  ;;  %v662_v5 = vld [vmem:[%s425_s19] sm:$0xff]  ;;  %v1498_v8 = vadd.s32 128, %v1495_v7  ;;  %v440_v13 = vand.u32 15, %v1495_v7  ;;  %vm573_vm2 = vcmp.lt.s32.totalorder %v1495_v7, 111  ;;  %vm1835_vm4 = vcmp.lt.s32.totalorder %v1495_v7, 112 }
  0x10   : > { %vm1832_vm7 = vcmp.lt.s32.totalorder %v1495_v7, 113  ;;  %vm1834_vm10 = vcmp.lt.s32.totalorder %v1495_v7, 127  ;;  %vm1829_vm11 = vcmp.lt.s32.totalorder %v1495_v7, 1  ;;  %vm460_vm12 = vcmp.ge.s32.totalorder %v1495_v7, 16 }
  0x11   : > { %v447_v9 = vand.u32 15, %v1498_v8  ;;  %vm1833_vm1 = vcmp.lt.s32.totalorder %v1498_v8, 240  ;;  %vm1521_vm6 = vcmp.le.s32.totalorder %v440_v13, 14  ;;  %vm1548_vm9 = vcmp.ge.s32.totalorder %v440_v13, 1 }
  0x12   : > { %vm1830_vm13 = vcmp.lt.s32.totalorder %v1495_v7, 15  ;;  %vm1586_vm14 = vmand %vm460_vm12, %vm1521_vm6  ;;  %vm1831_vm15 = vcmp.lt.s32.totalorder %v1495_v7, 16 }
  0x13   : > { %558 = vrot.lane.b32.xlu1 %v1456_v1, %s1359_s27  ;;  %571 = vrot.lane.b32.xlu0 %v1456_v1, %s1360_s28  ;;  %vm1501_vm0 = vcmp.le.s32.totalorder %v447_v9, 14  ;;  %vm1517_vm5 = vcmp.ge.s32.totalorder %v447_v9, 1 }
  0x14   : > { %vm1512_vm3 = vmand %vm1833_vm1, %vm1501_vm0 }
  0x15   : > { %vm1540_vm8 = vmand %vm1833_vm1, %vm1517_vm5 }
  0x17   : > { %545 = vrot.lane.b32.xlu1 %v1456_v1, %s1361_s29  ;;  %543 = vrot.lane.b32.xlu0 %v1450_v0, %s1361_s29 }
  0x1b   : > { %532 = vrot.lane.b32.xlu1 %v1456_v1, %s1362_s30  ;;  %530 = vrot.lane.b32.xlu0 %v1450_v0, %s1362_s30 }
  0x1f   : > { %519 = vrot.lane.b32.xlu1 %v1456_v1, %s1363_s13  ;;  %517 = vrot.lane.b32.xlu0 %v1450_v0, %s1363_s13 }
  0x23   : > { %506 = vrot.lane.b32.xlu1 %v1456_v1, %s1366_s14  ;;  %504 = vrot.lane.b32.xlu0 %v1450_v0, %s1366_s14 }
  0x27   : > { %493 = vrot.lane.b32.xlu1 %v1456_v1, %s1367_s16  ;;  %491 = vrot.lane.b32.xlu0 %v1450_v0, %s1367_s16 }
  0x2b   : > { %480 = vrot.lane.b32.xlu1 %v1456_v1, %s1368_s20  ;;  %478 = vrot.lane.b32.xlu0 %v1450_v0, %s1368_s20 }
  0x2f   : > { %584 = vperm.xlu0 %1337, %v477_v4   ;;  %665 = vperm.xlu1 %1338, %v662_v5  }
  0x81   : > { %v557_v10 = vpop.permute.xlu1 %556  ;;  %v570_v11 = vpop.permute.xlu0 %569 }
  0x85   : > { %v559_v15 = vpop.permute.xlu1 %558  ;;  %v572_v16 = vpop.permute.xlu0 %571 }
  0x86   : > { %v575_v19 = vsel %vm573_vm2, %v572_v16, %v570_v11  ;;  %v574_v20 = vsel %vm573_vm2, %v570_v11, %v572_v16  ;;  %v562_v21 = vsel %vm1835_vm4, %v559_v15, %v557_v10  ;;  %v561_v25 = vsel %vm1835_vm4, %v557_v10, %v559_v15 }
  0x87   : > { %1261 = vmatprep.subr.msk.mxu0 %vm1512_vm3, %v575_v19 }
  0x88   : > { %1262 = vmatpush1.msk.msra.mxu0 %vm1521_vm6, %v574_v20 }
  0x89   : > { %v546_v23 = vpop.permute.xlu1 %545  ;;  %1263 = vmatprep.subr.msk.mxu0 %vm1833_vm1, %v562_v21  ;;  %v544_v24 = vpop.permute.xlu0 %543 }
  0x8a   : > { %v548_v27 = vsel %vm1832_vm7, %v544_v24, %v546_v23  ;;  %v549_v28 = vsel %vm1832_vm7, %v546_v23, %v544_v24  ;;  %608 = vmatpush1.msra.mxu0 %v561_v25 }
  0x8b   : > { %1264 = vmatprep.subr.msk.mxu0 %vm1540_vm8, %v549_v28 }
  0x8c   : > { %1265 = vmatpush1.msk.msra.mxu0 %vm1548_vm9, %v548_v27 }
  0x8d   : > { %v533_v29 = vpop.permute.xlu1 %532  ;;  %v531_v30 = vpop.permute.xlu0 %530 }
  0x8e   : > { %v535_v31 = vsel %vm1834_vm10, %v531_v30, %v533_v29  ;;  %v536_v32 = vsel %vm1834_vm10, %v533_v29, %v531_v30 }
  0x8f   : > { %1266 = vmatprep.subr.msk.mxu0 %vm1501_vm0, %v536_v32 }
  0x90   : > { %1267 = vmatpush1.msk.msra.mxu0 %vm1521_vm6, %v535_v31 }
  0x91   : > { %v520_v33 = vpop.permute.xlu1 %519  ;;  %613 = vmatprep.subr.mxu0 %v1456_v1  ;;  %v518_v34 = vpop.permute.xlu0 %517 }
  0x92   : > { %v522_v35 = vsel %vm1829_vm11, %v518_v34, %v520_v33  ;;  %v523_v36 = vsel %vm1829_vm11, %v520_v33, %v518_v34  ;;  %614 = vmatpush1.msra.mxu0 %v1450_v0  ;;  %vm482_vm11 = vcmp.lt.s32.totalorder %v1495_v7, 17 }
  0x93   : > { %1268 = vmatprep.subr.msk.mxu0 %vm1517_vm5, %v522_v35 }
  0x94   : > { %1269 = vmatpush1.msk.msra.mxu0 %vm1548_vm9, %v523_v36 }
  0x95   : > { %v507_v37 = vpop.permute.xlu1 %506  ;;  %v505_v38 = vpop.permute.xlu0 %504 }
  0x96   : > { %v509_v40 = vsel %vm1830_vm13, %v505_v38, %v507_v37  ;;  %v510_v41 = vsel %vm1830_vm13, %v507_v37, %v505_v38  ;;  %vm1610_vm13 = vmand %vm460_vm12, %vm1548_vm9 }
  0x97   : > { %1270 = vmatprep.subr.msk.mxu0 %vm1501_vm0, %v509_v40 }
  0x98   : > { %1271 = vmatpush1.msk.msra.mxu0 %vm1586_vm14, %v510_v41 }
  0x99   : > { %v494_v42 = vpop.permute.xlu1 %493  ;;  %v492_v43 = vpop.permute.xlu0 %491 }
  0x9a   : > { %v497_v44 = vsel %vm1831_vm15, %v494_v42, %v492_v43  ;;  %v496_v45 = vsel %vm1831_vm15, %v492_v43, %v494_v42  ;;  %vm587_vm15 = vcmask 588800   ;;  %v713_v42 = vld [vmem:[%s1821_s5] sm:$0xff] }
  0x9b   : > { %619 = vmatprep.subr.mxu0 %v496_v45 }
  0x9c   : > { %1272 = vmatpush1.msk.msra.mxu0 %vm460_vm12, %v497_v44 }
  0x9d   : > { %v481_v46 = vpop.permute.xlu1 %480  ;;  %v479_v47 = vpop.permute.xlu0 %478 }
  0x9e   : > { %v483_v49 = vsel %vm482_vm11, %v479_v47, %v481_v46  ;;  %v484_v50 = vsel %vm482_vm11, %v481_v46, %v479_v47 }
  0x9f   : > { %1273 = vmatprep.subr.msk.mxu0 %vm1517_vm5, %v483_v49 }
  0xa0   : > { %1274 = vmatpush1.msk.msra.mxu0 %vm1610_vm13, %v484_v50 }
  0xa1   : > { %1275 = vmatmul.mubr.msk.f32.vlgmr.msra.gmra.mxu0 %vm587_vm15, %v476_v51 }
  0xa2   : > { %1091 = vmatprep.mubr.f32.mxu0 %v1364_v2 }
  0xaa   : > { %v585_v52 = vpop.permute.xlu0 %584  ;;  %v666_v54 = vpop.permute.xlu1 %665 }
 0x161   : > { %v657_v53 = vpop.f32.mrf.mxu0 }
 0x162   : > { %v658_v55 = vadd.f32 %v657_v53, %v585_v52 }
 0x163   : > { %v659_v56 = vpop.f32.mrf.mxu0 }
 0x164   : > { %v668_v57 = vadd.f32 %v666_v54, %v658_v55  ;;  %v660_v58 = vadd.f32 %v659_v56, %v585_v52 }
 0x166   : > { %v669_v59 = vadd.f32 %v666_v54, %v660_v58  ;;  %v682_v61 = vmul.f32 %v668_v57, %v668_v57 }
 0x168   : > { %v671_v60 = vadd.f32 %v669_v59, %v668_v57  ;;  %v683_v62 = vmul.f32 %v669_v59, %v669_v59 }
 0x16a   : > { %672 = vadd.xlane.f32.xlu1 %v671_v60  ;;  %v684_v63 = vadd.f32 %v683_v62, %v682_v61 }
 0x16c   : > { %685 = vadd.xlane.f32.xlu0 %v684_v63 }
 0x182   : > { %707 = vperm.xlu0 %1337, %v670_v3  }
 0x1f3   : > { %v673_v4 = vpop.xlane.xlu1 %672 }
 0x1f4   : > { %v674_v5 = vrot.slane %v673_v4, 4 }
 0x1f5   : > { %v686_v6 = vpop.xlane.xlu0 %685 }
 0x1f6   : > { %v675_v9 = vadd.f32 %v674_v5, %v673_v4  ;;  %v687_v10 = vrot.slane %v686_v6, 4 }
 0x1f8   : > { %v676_v11 = vrot.slane %v675_v9, 2  ;;  %v688_v13 = vadd.f32 %v687_v10, %v686_v6 }
 0x1fa   : > { %v689_v15 = vrot.slane %v688_v13, 2  ;;  %v677_v16 = vadd.f32 %v676_v11, %v675_v9 }
 0x1fc   : > { %v678_v19 = vrot.slane %v677_v16, 1  ;;  %v690_v20 = vadd.f32 %v689_v15, %v688_v13 }
 0x1fd   : > { %v708_v37 = vpop.permute.xlu0 %707 }
 0x1fe   : > { %v679_v21 = vadd.f32 %v678_v19, %v677_v16  ;;  %v691_v23 = vrot.slane %v690_v20, 1 }
 0x200   : > { %1311 = vpush %v679_v21  ;;  %v692_v24 = vadd.f32 %v691_v23, %v690_v20  ;;  %v712_v21 = vld [vmem:[%s1820_s4] sm:$0xff] }
 0x202   : > { %1313 = vpush %v692_v24 }
 0x231   : > { %s1312_s19 = spop %1311 }
 0x232   : > { %v681_v25 = vstv %s1312_s19 }
 0x233   : > { %v695_v27 = vmul.f32 0.00048828125, %v681_v25  ;;  %s1314_s24 = spop %1313 }
 0x234   : > { %v694_v28 = vstv %s1314_s24 }
 0x235   : > { %v696_v29 = vmul.f32 0.00048828125, %v694_v28  ;;  %v697_v30 = vmul.f32 %v695_v27, %v695_v27  ;;  %v699_v33 = vsub.f32 %v668_v57, %v695_v27  ;;  %v700_v35 = vsub.f32 %v669_v59, %v695_v27 }
 0x237   : > { %v698_v31 = vsub.f32 %v696_v29, %v697_v30 }
 0x239   : > { %v701_v32 = vadd.f32 1e-05, %v698_v31 }
 0x23b   : > { %1339 = vrsqrt.f32 %v701_v32 }
 0x248   : > { %v1340_v34 = vpop.eup %1339 }
 0x249   : > { %v703_v36 = vmul.f32 %v1340_v34, %v699_v33  ;;  %v704_v38 = vmul.f32 %v1340_v34, %v700_v35 }
 0x24b   : > { %v710_v40 = vadd.f32 %v708_v37, %v703_v36  ;;  %v711_v41 = vadd.f32 %v708_v37, %v704_v38 }
 0x24d   : > { %762 = vrot.lane.b32.xlu0 %v710_v40, %s1359_s27  ;;  %770 = vrot.lane.b32.xlu1 %v710_v40, %s1360_s28 }
 0x251   : > { %754 = vrot.lane.b32.xlu0 %v710_v40, %s1361_s29  ;;  %772 = vrot.lane.b32.xlu1 %v711_v41, %s1360_s28 }
 0x255   : > { %746 = vrot.lane.b32.xlu0 %v710_v40, %s1362_s30  ;;  %764 = vrot.lane.b32.xlu1 %v711_v41, %s1359_s27 }
 0x259   : > { %738 = vrot.lane.b32.xlu0 %v710_v40, %s1363_s13  ;;  %756 = vrot.lane.b32.xlu1 %v711_v41, %s1361_s29 }
 0x25d   : > { %730 = vrot.lane.b32.xlu0 %v710_v40, %s1366_s14  ;;  %748 = vrot.lane.b32.xlu1 %v711_v41, %s1362_s30 }
 0x261   : > { %722 = vrot.lane.b32.xlu0 %v710_v40, %s1367_s16  ;;  %740 = vrot.lane.b32.xlu1 %v711_v41, %s1363_s13 }
 0x265   : > { %714 = vrot.lane.b32.xlu0 %v710_v40, %s1368_s20  ;;  %732 = vrot.lane.b32.xlu1 %v711_v41, %s1366_s14 }
 0x269   : > { %780 = vperm.xlu0 %1337, %v713_v42   ;;  %724 = vrot.lane.b32.xlu1 %v711_v41, %s1367_s16 }
 0x26d   : > { %716 = vrot.lane.b32.xlu1 %v711_v41, %s1368_s20 }
 0x2bf   : > { %v763_v43 = vpop.permute.xlu0 %762  ;;  %v771_v44 = vpop.permute.xlu1 %770 }
 0x2c3   : > { %v755_v45 = vpop.permute.xlu0 %754  ;;  %v773_v46 = vpop.permute.xlu1 %772 }
 0x2c4   : > { %v775_v47 = vsel %vm573_vm2, %v773_v46, %v771_v44  ;;  %v774_v49 = vsel %vm573_vm2, %v771_v44, %v773_v46 }
 0x2c5   : > { %1276 = vmatprep.subr.msk.mxu1 %vm1512_vm3, %v775_v47 }
 0x2c6   : > { %1277 = vmatpush1.msk.msra.mxu1 %vm1521_vm6, %v774_v49 }
 0x2c7   : > { %v747_v50 = vpop.permute.xlu0 %746  ;;  %v765_v51 = vpop.permute.xlu1 %764 }
 0x2c8   : > { %v767_v52 = vsel %vm1835_vm4, %v765_v51, %v763_v43  ;;  %v766_v53 = vsel %vm1835_vm4, %v763_v43, %v765_v51 }
 0x2c9   : > { %1278 = vmatprep.subr.msk.mxu1 %vm1833_vm1, %v767_v52 }
 0x2ca   : > { %803 = vmatpush1.msra.mxu1 %v766_v53 }
 0x2cb   : > { %v757_v54 = vpop.permute.xlu1 %756  ;;  %v739_v57 = vpop.permute.xlu0 %738 }
 0x2cc   : > { %v758_v55 = vsel %vm1832_vm7, %v755_v45, %v757_v54  ;;  %v759_v56 = vsel %vm1832_vm7, %v757_v54, %v755_v45  ;;  %vm1852_vm7 = vcmp.lt.s32.totalorder %v1495_v7, 1 }
 0x2cd   : > { %1279 = vmatprep.subr.msk.mxu1 %vm1540_vm8, %v759_v56  ;;  %vm1853_vm1 = vmmov %vm1852_vm7 }
 0x2ce   : > { %1280 = vmatpush1.msk.msra.mxu1 %vm1548_vm9, %v758_v55 }
 0x2cf   : > { %v749_v58 = vpop.permute.xlu1 %748  ;;  %v731_v61 = vpop.permute.xlu0 %730 }
 0x2d0   : > { %v750_v59 = vsel %vm1834_vm10, %v747_v50, %v749_v58  ;;  %v751_v60 = vsel %vm1834_vm10, %v749_v58, %v747_v50  ;;  %vm1854_vm10 = vcmp.lt.s32.totalorder %v1495_v7, 15 }
 0x2d1   : > { %1281 = vmatprep.subr.msk.mxu1 %vm1501_vm0, %v751_v60  ;;  %vm1855_vm4 = vmmov %vm1854_vm10 }
 0x2d2   : > { %1282 = vmatpush1.msk.msra.mxu1 %vm1521_vm6, %v750_v59 }
 0x2d3   : > { %808 = vmatprep.subr.mxu1 %v711_v41  ;;  %v741_v62 = vpop.permute.xlu1 %740  ;;  %v723_v9 = vpop.permute.xlu0 %722 }
 0x2d4   : > { %v742_v63 = vsel %vm1852_vm7, %v739_v57, %v741_v62  ;;  %v743_v3 = vsel %vm1853_vm1, %v741_v62, %v739_v57  ;;  %809 = vmatpush1.msra.mxu1 %v710_v40  ;;  %vm1856_vm1 = vcmp.lt.s32.totalorder %v1495_v7, 16 }
 0x2d5   : > { %1283 = vmatprep.subr.msk.mxu1 %vm1517_vm5, %v742_v63  ;;  %vm1857_vm7 = vmmov %vm1856_vm1 }
 0x2d6   : > { %1284 = vmatpush1.msk.msra.mxu1 %vm1548_vm9, %v743_v3 }
 0x2d7   : > { %v733_v4 = vpop.permute.xlu1 %732  ;;  %v715_v15 = vpop.permute.xlu0 %714 }
 0x2d8   : > { %v734_v5 = vsel %vm1854_vm10, %v731_v61, %v733_v4  ;;  %v735_v6 = vsel %vm1855_vm4, %v733_v4, %v731_v61 }
 0x2d9   : > { %1285 = vmatprep.subr.msk.mxu1 %vm1501_vm0, %v734_v5 }
 0x2da   : > { %1286 = vmatpush1.msk.msra.mxu1 %vm1586_vm14, %v735_v6 }
 0x2db   : > { %v725_v10 = vpop.permute.xlu1 %724 }
 0x2dc   : > { %v727_v11 = vsel %vm1856_vm1, %v725_v10, %v723_v9  ;;  %v726_v13 = vsel %vm1857_vm7, %v723_v9, %v725_v10  ;;  %vm1105_vm1 = vcmask 64512   ;;  %vm1858_vm7 = vcmp.lt.s32.totalorder %v1495_v7, 112 }
 0x2dd   : > { %814 = vmatprep.subr.mxu1 %v726_v13 }
 0x2de   : > { %1287 = vmatpush1.msk.msra.mxu1 %vm460_vm12, %v727_v11 }
 0x2df   : > { %v717_v16 = vpop.permute.xlu1 %716 }
 0x2e0   : > { %v718_v19 = vsel %vm482_vm11, %v715_v15, %v717_v16  ;;  %v719_v20 = vsel %vm482_vm11, %v717_v16, %v715_v15 }
 0x2e1   : > { %1288 = vmatprep.subr.msk.mxu1 %vm1517_vm5, %v718_v19 }
 0x2e2   : > { %1289 = vmatpush1.msk.msra.mxu1 %vm1610_vm13, %v719_v20 }
 0x2e3   : > { %1290 = vmatmul.mubr.msk.f32.vlgmr.msra.gmra.mxu1 %vm587_vm15, %v712_v21  ;;  %1139 = vmatprep.subr.mxu1 %v1456_v1 }
 0x2e4   : > { %1140 = vmatpush1.msra.mxu1 %v1450_v0  ;;  %1173 = vmatprep.mubr.f32.mxu1 %v1364_v2  ;;  %v781_v23 = vpop.permute.xlu0 %780 }
 0x3a3   : > { %v852_v24 = vpop.f32.mrf.mxu1 }
 0x3a4   : > { %v853_v25 = vadd.f32 %v852_v24, %v781_v23 }
 0x3a5   : > { %v854_v27 = vpop.f32.mrf.mxu1 }
 0x3a6   : > { %v859_v28 = vmul.f32 0.70710677, %v853_v25  ;;  %v855_v29 = vadd.f32 %v854_v27, %v781_v23  ;;  %v857_v15 = vmul.f32 0.5, %v853_v25  ;;  %v1098_v25 = vld [vmem:[%s1826_s10] sm:$0xff] }
 0x3a7   : > { %1306 = vmatmul.mubr.msk.f32.vlgmr.msra.gmra.mxu1 %vm1105_vm1, %v1098_v25  ;;  %vm1863_vm1 = vcmp.lt.s32.totalorder %v1495_v7, 127 }
 0x3a8   : > { %v861_v30 = vand.u32 2147483647, %v859_v28  ;;  %v860_v31 = vmul.f32 0.70710677, %v855_v29  ;;  %vm901_vm4 = vcmp.ge.f32.partialorder %v859_v28, 0.0  ;;  %v858_v20 = vmul.f32 0.5, %v855_v29 }
 0x3a9   : > { %v911_v28 = vld [vmem:[%s1825_s9] sm:$0xff] }
 0x3aa   : > { %v863_v32 = vmul.f32 0.3275911, %v861_v30  ;;  %v862_v33 = vand.u32 2147483647, %v860_v31  ;;  %v889_v1 = vsub.f32 0.0, %v861_v30  ;;  %vm902_vm10 = vcmp.ge.f32.partialorder %v860_v31, 0.0 }
 0x3ac   : > { %v865_v34 = vadd.f32 1.0, %v863_v32  ;;  %v864_v35 = vmul.f32 0.3275911, %v862_v33  ;;  %v890_v37 = vsub.f32 0.0, %v862_v33  ;;  %v891_v0 = vmul.f32 %v889_v1, %v861_v30 }
 0x3ae   : > { %1341 = vrcp.f32 %v865_v34  ;;  %v866_v36 = vadd.f32 1.0, %v864_v35  ;;  %v892_v2 = vmul.f32 %v890_v37, %v862_v33  ;;  %v893_v41 = vmul.f32 1.442695, %v891_v0 }
 0x3b0   : > { %1343 = vrcp.f32 %v866_v36  ;;  %v895_v45 = vmul.f32 1.442695, %v892_v2 }
 0x3b1   : > { %1345 = vpow2.f32 %v893_v41 }
 0x3b2   : > { %1347 = vpow2.f32 %v895_v45 }
 0x3bb   : > { %v1342_v38 = vpop.eup %1341 }
 0x3bc   : > { %v871_v40 = vmul.f32 1.0614054, %v1342_v38 }
 0x3bd   : > { %v1344_v42 = vpop.eup %1343 }
 0x3be   : > { %v873_v43 = vadd.f32 -1.4531521, %v871_v40  ;;  %v872_v44 = vmul.f32 1.0614054, %v1344_v42  ;;  %v1346_v60 = vpop.eup %1345 }
 0x3bf   : > { %v1348_v3 = vpop.eup %1347 }
 0x3c0   : > { %v875_v46 = vmul.f32 %v1342_v38, %v873_v43  ;;  %v874_v47 = vadd.f32 -1.4531521, %v872_v44 }
 0x3c2   : > { %v877_v49 = vadd.f32 1.4214138, %v875_v46  ;;  %v876_v50 = vmul.f32 %v1344_v42, %v874_v47 }
 0x3c4   : > { %v879_v51 = vmul.f32 %v1342_v38, %v877_v49  ;;  %v878_v52 = vadd.f32 1.4214138, %v876_v50 }
 0x3c6   : > { %v881_v53 = vadd.f32 -0.28449672, %v879_v51  ;;  %v880_v54 = vmul.f32 %v1344_v42, %v878_v52 }
 0x3c8   : > { %v883_v55 = vmul.f32 %v1342_v38, %v881_v53  ;;  %v882_v56 = vadd.f32 -0.28449672, %v880_v54 }
 0x3ca   : > { %v885_v57 = vadd.f32 0.2548296, %v883_v55  ;;  %v884_v58 = vmul.f32 %v1344_v42, %v882_v56 }
 0x3cc   : > { %v887_v59 = vmul.f32 %v1342_v38, %v885_v57  ;;  %v886_v61 = vadd.f32 0.2548296, %v884_v58 }
 0x3ce   : > { %v897_v62 = vmul.f32 %v1346_v60, %v887_v59  ;;  %v888_v63 = vmul.f32 %v1344_v42, %v886_v61  ;;  %v954_v59 = vld [vmem:[%s1824_s8] sm:$0xff] }
 0x3cf   : > { %v1099_v60 = vld [vmem:[%s1827_s11] sm:$0xff] }
 0x3d0   : > { %v899_v4 = vsub.f32 1.0, %v897_v62  ;;  %v898_v5 = vmul.f32 %v1348_v3, %v888_v63 }
 0x3d2   : > { %v903_v6 = vsub.f32 0.0, %v899_v4  ;;  %v900_v9 = vsub.f32 1.0, %v898_v5 }
 0x3d4   : > { %v905_v10 = vsel %vm901_vm4, %v899_v4, %v903_v6  ;;  %v904_v13 = vsub.f32 0.0, %v900_v9  ;;  %vm1859_vm4 = vmmov %vm1858_vm7 }
 0x3d5   : > { %v907_v11 = vadd.f32 1.0, %v905_v10 }
 0x3d6   : > { %v906_v16 = vsel %vm902_vm10, %v900_v9, %v904_v13  ;;  %vm1860_vm10 = vcmp.lt.s32.totalorder %v1498_v8, 240 }
 0x3d7   : > { %v909_v19 = vmul.f32 %v907_v11, %v857_v15  ;;  %v908_v21 = vadd.f32 1.0, %v906_v16 }
 0x3d9   : > { %v910_v23 = vmul.f32 %v908_v21, %v858_v20  ;;  %v923_v27 = vmul.f32 %v909_v19, %v909_v19 }
 0x3db   : > { %v912_v24 = vadd.f32 %v910_v23, %v909_v19  ;;  %v924_v30 = vmul.f32 %v910_v23, %v910_v23 }
 0x3dd   : > { %913 = vadd.xlane.f32.xlu1 %v912_v24  ;;  %v925_v32 = vadd.f32 %v924_v30, %v923_v27 }
 0x3df   : > { %926 = vadd.xlane.f32.xlu0 %v925_v32 }
 0x3f5   : > { %948 = vperm.xlu0 %1337, %v911_v28  }
 0x466   : > { %v914_v29 = vpop.xlane.xlu1 %913 }
 0x467   : > { %v915_v31 = vrot.slane %v914_v29, 4 }
 0x468   : > { %v927_v33 = vpop.xlane.xlu0 %926 }
 0x469   : > { %v916_v34 = vadd.f32 %v915_v31, %v914_v29  ;;  %v928_v35 = vrot.slane %v927_v33, 4 }
 0x46b   : > { %v917_v36 = vrot.slane %v916_v34, 2  ;;  %v929_v1 = vadd.f32 %v928_v35, %v927_v33  ;;  %v953_v33 = vld [vmem:[%s1823_s7] sm:$0xff] }
 0x46d   : > { %v930_v37 = vrot.slane %v929_v1, 2  ;;  %v918_v0 = vadd.f32 %v917_v36, %v916_v34  ;;  %v1175_v34 = vpop.f32.mrf.mxu1 }
 0x46f   : > { %v919_v38 = vrot.slane %v918_v0, 1  ;;  %v931_v2 = vadd.f32 %v930_v37, %v929_v1  ;;  %v1177_v36 = vpop.f32.mrf.mxu1 }
 0x470   : > { %v949_v55 = vpop.permute.xlu0 %948 }
 0x471   : > { %v920_v40 = vadd.f32 %v919_v38, %v918_v0  ;;  %v932_v41 = vrot.slane %v931_v2, 1 }
 0x473   : > { %1315 = vpush %v920_v40  ;;  %v933_v42 = vadd.f32 %v932_v41, %v931_v2 }
 0x475   : > { %1317 = vpush %v933_v42 }
 0x4a4   : > { %s1316_s26 = spop %1315 }
 0x4a5   : > { %v922_v43 = vstv %s1316_s26 }
 0x4a6   : > { %v936_v44 = vmul.f32 0.00048828125, %v922_v43  ;;  %s1318_s15 = spop %1317 }
 0x4a7   : > { %v935_v45 = vstv %s1318_s15 }
 0x4a8   : > { %v937_v46 = vmul.f32 0.00048828125, %v935_v45  ;;  %v938_v47 = vmul.f32 %v936_v44, %v936_v44  ;;  %v940_v51 = vsub.f32 %v909_v19, %v936_v44  ;;  %v941_v53 = vsub.f32 %v910_v23, %v936_v44 }
 0x4aa   : > { %v939_v49 = vsub.f32 %v937_v46, %v938_v47 }
 0x4ac   : > { %v942_v50 = vadd.f32 1e-05, %v939_v49 }
 0x4ae   : > { %1349 = vrsqrt.f32 %v942_v50 }
 0x4bb   : > { %v1350_v52 = vpop.eup %1349 }
 0x4bc   : > { %v944_v54 = vmul.f32 %v1350_v52, %v940_v51  ;;  %v945_v56 = vmul.f32 %v1350_v52, %v941_v53 }
 0x4be   : > { %v951_v57 = vadd.f32 %v949_v55, %v944_v54  ;;  %v952_v58 = vadd.f32 %v949_v55, %v945_v56 }
 0x4c0   : > { %1003 = vrot.lane.b32.xlu0 %v951_v57, %s1359_s27  ;;  %1011 = vrot.lane.b32.xlu1 %v951_v57, %s1360_s28 }
 0x4c4   : > { %995 = vrot.lane.b32.xlu0 %v951_v57, %s1361_s29  ;;  %1013 = vrot.lane.b32.xlu1 %v952_v58, %s1360_s28 }
 0x4c8   : > { %987 = vrot.lane.b32.xlu0 %v951_v57, %s1362_s30  ;;  %1005 = vrot.lane.b32.xlu1 %v952_v58, %s1359_s27 }
 0x4cc   : > { %979 = vrot.lane.b32.xlu0 %v951_v57, %s1363_s13  ;;  %997 = vrot.lane.b32.xlu1 %v952_v58, %s1361_s29 }
 0x4d0   : > { %971 = vrot.lane.b32.xlu0 %v951_v57, %s1366_s14  ;;  %989 = vrot.lane.b32.xlu1 %v952_v58, %s1362_s30 }
 0x4d4   : > { %963 = vrot.lane.b32.xlu0 %v951_v57, %s1367_s16  ;;  %981 = vrot.lane.b32.xlu1 %v952_v58, %s1363_s13 }
 0x4d8   : > { %955 = vrot.lane.b32.xlu0 %v951_v57, %s1368_s20  ;;  %973 = vrot.lane.b32.xlu1 %v952_v58, %s1366_s14 }
 0x4dc   : > { %1021 = vperm.xlu0 %1337, %v954_v59   ;;  %965 = vrot.lane.b32.xlu1 %v952_v58, %s1367_s16 }
 0x4e0   : > { %957 = vrot.lane.b32.xlu1 %v952_v58, %s1368_s20  ;;  %s430_s20 = scalar_lea.vmem %s1828_s12, %s1309_s23 }
 0x4e4   : > { %1102 = vperm.xlu1 %1338, %v1099_v60  }
 0x532   : > { %v1004_v61 = vpop.permute.xlu0 %1003  ;;  %v1012_v62 = vpop.permute.xlu1 %1011 }
 0x536   : > { %v996_v63 = vpop.permute.xlu0 %995  ;;  %v1014_v3 = vpop.permute.xlu1 %1013 }
 0x537   : > { %v1015_v4 = vsel %vm573_vm2, %v1012_v62, %v1014_v3  ;;  %v1016_v5 = vsel %vm573_vm2, %v1014_v3, %v1012_v62  ;;  %vm1861_vm2 = vcmp.lt.s32.totalorder %v1495_v7, 113 }
 0x538   : > { %1291 = vmatprep.subr.msk.mxu0 %vm1512_vm3, %v1016_v5  ;;  %vm1862_vm3 = vmmov %vm1861_vm2 }
 0x539   : > { %1292 = vmatpush1.msk.msra.mxu0 %vm1521_vm6, %v1015_v4 }
 0x53a   : > { %v988_v6 = vpop.permute.xlu0 %987  ;;  %v1006_v9 = vpop.permute.xlu1 %1005 }
 0x53b   : > { %v1007_v10 = vsel %vm1858_vm7, %v1004_v61, %v1006_v9  ;;  %v1008_v11 = vsel %vm1859_vm4, %v1006_v9, %v1004_v61  ;;  %vm1864_vm7 = vmmov %vm1863_vm1 }
 0x53c   : > { %1293 = vmatprep.subr.msk.mxu0 %vm1860_vm10, %v1008_v11  ;;  %vm1867_vm10 = vcmp.lt.s32.totalorder %v1495_v7, 15 }
 0x53d   : > { %1044 = vmatpush1.msra.mxu0 %v1007_v10 }
 0x53e   : > { %v998_v13 = vpop.permute.xlu1 %997  ;;  %v980_v16 = vpop.permute.xlu0 %979 }
 0x53f   : > { %v999_v14 = vsel %vm1861_vm2, %v996_v63, %v998_v13  ;;  %v1000_v15 = vsel %vm1862_vm3, %v998_v13, %v996_v63  ;;  %vm1869_vm2 = vcmp.lt.s32.totalorder %v1495_v7, 16 }
 0x540   : > { %1294 = vmatprep.subr.msk.mxu0 %vm1540_vm8, %v1000_v15  ;;  %vm1865_vm8 = vcmp.lt.s32.totalorder %v1495_v7, 1 }
 0x541   : > { %1295 = vmatpush1.msk.msra.mxu0 %vm1548_vm9, %v999_v14  ;;  %vm1866_vm4 = vmmov %vm1865_vm8 }
 0x542   : > { %v990_v19 = vpop.permute.xlu1 %989  ;;  %v972_v21 = vpop.permute.xlu0 %971 }
 0x543   : > { %v991_v8 = vsel %vm1863_vm1, %v988_v6, %v990_v19  ;;  %v992_v20 = vsel %vm1864_vm7, %v990_v19, %v988_v6 }
 0x544   : > { %1296 = vmatprep.subr.msk.mxu0 %vm1501_vm0, %v992_v20 }
 0x545   : > { %1297 = vmatpush1.msk.msra.mxu0 %vm1521_vm6, %v991_v8  ;;  %vm1868_vm6 = vmmov %vm1867_vm10 }
 0x546   : > { %1049 = vmatprep.subr.mxu0 %v952_v58  ;;  %v982_v22 = vpop.permute.xlu1 %981  ;;  %v964_v32 = vpop.permute.xlu0 %963 }
 0x547   : > { %v983_v23 = vsel %vm1865_vm8, %v980_v16, %v982_v22  ;;  %v984_v24 = vsel %vm1866_vm4, %v982_v22, %v980_v16  ;;  %1050 = vmatpush1.msra.mxu0 %v951_v57 }
 0x548   : > { %1298 = vmatprep.subr.msk.mxu0 %vm1517_vm5, %v983_v23 }
 0x549   : > { %1299 = vmatpush1.msk.msra.mxu0 %vm1548_vm9, %v984_v24  ;;  %vm1870_vm9 = vmmov %vm1869_vm2 }
 0x54a   : > { %v974_v27 = vpop.permute.xlu1 %973  ;;  %v956_v29 = vpop.permute.xlu0 %955 }
 0x54b   : > { %v975_v18 = vsel %vm1867_vm10, %v972_v21, %v974_v27  ;;  %v976_v30 = vsel %vm1868_vm6, %v974_v27, %v972_v21 }
 0x54c   : > { %1300 = vmatprep.subr.msk.mxu0 %vm1501_vm0, %v975_v18 }
 0x54d   : > { %1301 = vmatpush1.msk.msra.mxu0 %vm1586_vm14, %v976_v30 }
 0x54e   : > { %v966_v28 = vpop.permute.xlu1 %965 }
 0x54f   : > { %v968_v25 = vsel %vm1869_vm2, %v966_v28, %v964_v32  ;;  %v967_v26 = vsel %vm1870_vm9, %v964_v32, %v966_v28 }
 0x550   : > { %1055 = vmatprep.subr.mxu0 %v967_v26 }
 0x551   : > { %1302 = vmatpush1.msk.msra.mxu0 %vm460_vm12, %v968_v25 }
 0x552   : > { %v958_v31 = vpop.permute.xlu1 %957 }
 0x553   : > { %v959_v12 = vsel %vm482_vm11, %v956_v29, %v958_v31  ;;  %v960_v39 = vsel %vm482_vm11, %v958_v31, %v956_v29 }
 0x554   : > { %1303 = vmatprep.subr.msk.mxu0 %vm1517_vm5, %v959_v12 }
 0x555   : > { %1304 = vmatpush1.msk.msra.mxu0 %vm1610_vm13, %v960_v39 }
 0x556   : > { %1305 = vmatmul.mubr.msk.f32.vlgmr.msra.gmra.mxu0 %vm587_vm15, %v953_v33 }
 0x557   : > { %v1022_v1 = vpop.permute.xlu0 %1021 }
 0x55f   : > { %v1103_v35 = vpop.permute.xlu1 %1102 }
 0x560   : > { %v1176_v0 = vadd.f32 %v1175_v34, %v1103_v35  ;;  %v1178_v17 = vadd.f32 %v1177_v36, %v1103_v35 }
 0x616   : > { %v1093_v37 = vpop.f32.mrf.mxu0 }
 0x617   : > { %v1094_v7 = vadd.f32 %v1093_v37, %v1022_v1 }
 0x618   : > { %v1095_v38 = vpop.f32.mrf.mxu0 }
 0x619   : > { %v1180_v2 = vadd.f32 %v1176_v0, %v1094_v7  ;;  %v1096_v40 = vadd.f32 %v1095_v38, %v1022_v1 }
 0x61b   : > { %1182 = vst [vmem:[%s430_s20] sm:$0xff] %v1180_v2  ;;  %v1181_v48 = vadd.f32 %v1178_v17, %v1096_v40 }
 0x61d   : > { %1183 = vst [vmem:[%s430_s20 + $0x8] sm:$0xff] %v1181_v48 }
 0x61e PF: > { %s22_s21 = sadd.s32 1, %s1357_s21  }
 0x61f   : > { %p19_p4 = scmp.ge.s32.totalorder %s22_s21, 4  }
 0x621   :  { %21 = sbr.rel (!%p19_p4) target bundleno = 1 (0x1), region = 101 }

</bundles_post_ra>
